<compile_context>
chip_gen: v6e
topology: v6e:2x2x1
jax: 0.10.0
libtpu: 0.0.40
codegen_flags: <defaults>
</compile_context>

<pallas_src>
import functools

import jax
import jax.numpy as jnp
from jax.experimental import pallas as pl
from jax.experimental.pallas import tpu as pltpu

_LANES = 128  # vreg lane width -> pad the feature dim to a multiple of this.


def _round_up(x, m):
    return ((x + m - 1) // m) * m


def dnn_kernel(x_ref, w_ref, b_ref, out_ref, *, n_layers):
    """Fused MLP chain on one (M, D) activation tile.

    x_ref  : (M, D)              zero-padded activations
    w_ref  : (n_layers, D, D)    zero-padded weights (layer i: y = x @ w[i] + b[i])
    b_ref  : (n_layers, 1, D)    zero-padded biases
    out_ref: (M, D)              padded output (cols >= output_dim are 0)
    """
    h = x_ref[...]
    # Static Python unroll over layers (n_layers is small): the scheduler can
    # overlap the VMEM load of w_ref[i+1] with the current matmul.
    for i in range(n_layers - 1):
        h = jnp.maximum(
            jnp.dot(h, w_ref[i], preferred_element_type=jnp.float32) + b_ref[i],
            0.0,
        )
    # Final linear (no activation).
    out_ref[...] = (
        jnp.dot(h, w_ref[n_layers - 1], preferred_element_type=jnp.float32)
        + b_ref[n_layers - 1]
    )


def pack_params(w1, b1, wh, bh, wo, bo):
    """Zero-pad every layer to a common lane-dense (D, D)/(1, D) and stack.

    Done once at init time so each forward call DMAs exactly two weight
    operands (plus the activation) instead of seven.  D is a multiple of 128
    so every in-kernel tile has a lane-dense last dim.
    """
    input_dim, hidden = w1.shape
    n_hidden = wh.shape[0]
    out_dim = wo.shape[1]
    D = _round_up(max(input_dim, hidden, out_dim), _LANES)
    n_layers = n_hidden + 2

    W = jnp.zeros((n_layers, D, D), jnp.float32)
    B = jnp.zeros((n_layers, 1, D), jnp.float32)
    W = W.at[0, :input_dim, :hidden].set(w1)
    B = B.at[0, :, :hidden].set(b1)
    for i in range(n_hidden):
        W = W.at[1 + i, :hidden, :hidden].set(wh[i])
        B = B.at[1 + i, :, :hidden].set(bh[i])
    W = W.at[n_layers - 1, :hidden, :out_dim].set(wo)
    B = B.at[n_layers - 1, :, :out_dim].set(bo)
    return W, B


def _vmem_bytes_estimate(n_layers, D, tile_s, *, weight_buffers, itemsize=4):
    acts = 2 * 2 * tile_s * D * itemsize                      # in + out, double-buffered
    wts = weight_buffers * n_layers * (D * D + D) * itemsize  # resident packed W + B
    return acts + wts


def dnn_forward(x, w_packed, b_packed, *, output_dim):
    """Single-state forward matching DNN.forward(x): (B, input_dim) -> (output_dim,).

    Fallback path only: at M=1 the call is pure launch/DMA latency.  Route hot
    loops through dnn_forward_batched instead.
    """
    n_layers, D, _ = w_packed.shape
    input_dim = x.shape[1]
    # Only row 0 reaches the final linear -> drop dead batch rows up front,
    # and zero-pad features to the packed lane-dense width D.
    x0 = jnp.zeros((1, D), jnp.float32).at[:, :input_dim].set(x[0:1, :])

    vmem = pl.BlockSpec(memory_space=pltpu.MemorySpace.VMEM)
    out = pl.pallas_call(
        functools.partial(dnn_kernel, n_layers=n_layers),
        out_shape=jax.ShapeDtypeStruct((1, D), jnp.float32),
        in_specs=[vmem, vmem, vmem],
        out_specs=vmem,
    )(x0, w_packed, b_packed)
    return out[0, :output_dim]


def dnn_forward_batched(xs, w_packed, b_packed, *, output_dim, tile_s=256,
                        single_buffer_weights=True):
    """Evaluate many independent states per call: xs (S, input_dim) -> (S, output_dim).

    Weights/biases stay VMEM-resident across all grid steps (constant
    index_map, single-buffered); the state axis is "parallel" so with >=2
    grid steps both v7x TensorCores get work.  Ragged S is zero-padded up to
    a tile multiple and the result sliced back.
    """
    n_layers, D, _ = w_packed.shape
    S, input_dim = xs.shape
    assert tile_s % 8 == 0, "tile_s must be a sublane multiple"

    S_pad = _round_up(max(S, tile_s), tile_s)
    xs_pad = jnp.zeros((S_pad, D), jnp.float32).at[:S, :input_dim].set(xs)

    # VMEM budget guard (v7x has only 64 MiB physical; keep generous headroom).
    est = _vmem_bytes_estimate(
        n_layers, D, tile_s, weight_buffers=1 if single_buffer_weights else 2)
    assert est <= 48 * 1024 * 1024, (
        f"VMEM estimate {est/2**20:.1f} MiB too large for v7x; shrink tile_s "
        "or switch to a per-layer (K-tiled) pipeline over an 'arbitrary' axis.")
    vmem_limit = min(max(2 * est, 16 * 1024 * 1024), 48 * 1024 * 1024)

    def run(weight_pipeline_mode):
        w_spec = pl.BlockSpec((n_layers, D, D), lambda s: (0, 0, 0),
                              pipeline_mode=weight_pipeline_mode)
        b_spec = pl.BlockSpec((n_layers, 1, D), lambda s: (0, 0, 0),
                              pipeline_mode=weight_pipeline_mode)
        return pl.pallas_call(
            functools.partial(dnn_kernel, n_layers=n_layers),
            out_shape=jax.ShapeDtypeStruct((S_pad, D), jnp.float32),
            grid_spec=pltpu.PrefetchScalarGridSpec(
                num_scalar_prefetch=0,
                grid=(S_pad // tile_s,),
                in_specs=[
                    pl.BlockSpec((tile_s, D), lambda s: (s, 0)),
                    w_spec,
                    b_spec,
                ],
                out_specs=pl.BlockSpec((tile_s, D), lambda s: (s, 0)),
            ),
            compiler_params=pltpu.CompilerParams(
                dimension_semantics=("parallel",),
                vmem_limit_bytes=vmem_limit,
            ),
        )(xs_pad, w_packed, b_packed)

    if single_buffer_weights:
        try:
            out = run(pl.Buffered(1))
        except Exception:
            # Older/newer JAX may reject single-buffering; default double-buffer
            # is still tiny for these weights.
            out = run(None)
    else:
        out = run(None)
    return out[:S, :output_dim]


def init_params(key, input_dim, hidden_dim, n_hidden, output_dim):
    k = jax.random.split(key, 6)
    w1 = 0.1 * jax.random.normal(k[0], (input_dim, hidden_dim), jnp.float32)
    b1 = 0.1 * jax.random.normal(k[1], (1, hidden_dim), jnp.float32)
    wh = 0.1 * jax.random.normal(k[2], (n_hidden, hidden_dim, hidden_dim), jnp.float32)
    bh = 0.1 * jax.random.normal(k[3], (n_hidden, 1, hidden_dim), jnp.float32)
    wo = 0.1 * jax.random.normal(k[4], (hidden_dim, output_dim), jnp.float32)
    bo = 0.1 * jax.random.normal(k[5], (1, output_dim), jnp.float32)
    return w1, b1, wh, bh, wo, bo


def reference_forward(x, w1, b1, wh, bh, wo, bo):
    h = jnp.maximum(x @ w1 + b1, 0.0)
    for i in range(wh.shape[0]):
        h = jnp.maximum(h @ wh[i] + bh[i], 0.0)
    return (h[0:1] @ wo + bo)[0]


if __name__ == "__main__":
    # Small shapes consistent with the module: batch=2, input_dim=16,
    # hidden_dim=32, n_hidden=2, output_dim=9.
    B, INPUT_DIM, HIDDEN_DIM, N_HIDDEN, OUTPUT_DIM = 2, 16, 32, 2, 9

    key = jax.random.PRNGKey(0)
    key_x, key_xs, key_p = jax.random.split(key, 3)
    x = jax.random.normal(key_x, (B, INPUT_DIM), jnp.float32)
    params = init_params(key_p, INPUT_DIM, HIDDEN_DIM, N_HIDDEN, OUTPUT_DIM)

    # Pack all weights/biases once (amortized across every forward call).
    w_packed, b_packed = pack_params(*params)

    # TODO(synk): Dropout is treated as identity (eval mode); training-mode
    # stochastic dropout is not implemented.

    # --- single-state forward (matches DNN.forward(x) -> (output_dim,)) ---
    out = dnn_forward(x, w_packed, b_packed, output_dim=OUTPUT_DIM)
    out = jax.block_until_ready(out)
    ref = reference_forward(x, *params)
    assert out.shape == (OUTPUT_DIM,)
    assert jnp.allclose(out, ref, atol=2e-5, rtol=2e-5)

    # --- batched variant: many independent states per call (hot path) ---
    S, TILE_S = 500, 256  # ragged S exercises the padding path; 2 grid steps.
    xs = jax.random.normal(key_xs, (S, INPUT_DIM), jnp.float32)
    outs = dnn_forward_batched(
        xs, w_packed, b_packed, output_dim=OUTPUT_DIM, tile_s=TILE_S)
    outs = jax.block_until_ready(outs)

    w1, b1, wh, bh, wo, bo = params
    h = jnp.maximum(xs @ w1 + b1, 0.0)
    for i in range(N_HIDDEN):
        h = jnp.maximum(h @ wh[i] + bh[i], 0.0)
    refs = h @ wo + bo
    assert outs.shape == (S, OUTPUT_DIM)
    assert jnp.allclose(outs, refs, atol=2e-5, rtol=2e-5)

    print("KERNEL_OK")
</pallas_src>

<mosaic_0001>
module attributes {stable_mosaic.version = 11 : i64} {
  func.func @dnn_kernel(%arg0: memref<1x128xf32, #tpu.memory_space<vmem>>, %arg1: memref<4x128x128xf32, #tpu.memory_space<vmem>>, %arg2: memref<4x1x128xf32, #tpu.memory_space<vmem>>, %arg3: memref<1x128xf32, #tpu.memory_space<vmem>>) attributes {dimension_semantics = [], scalar_prefetch = 0 : i64, scratch_operands = 0 : i64, tpu.core_type = #tpu.core_type<tc>} {
    %c0 = arith.constant 0 : index
    %c0_0 = arith.constant 0 : index
    %0 = vector.load %arg0[%c0, %c0_0] : memref<1x128xf32, #tpu.memory_space<vmem>>, vector<1x128xf32>
    %c0_1 = arith.constant 0 : index
    %c0_2 = arith.constant 0 : index
    %c0_3 = arith.constant 0 : index
    %1 = vector.load %arg1[%c0_1, %c0_2, %c0_3] : memref<4x128x128xf32, #tpu.memory_space<vmem>>, vector<1x128x128xf32>
    %2 = vector.shape_cast %1 : vector<1x128x128xf32> to vector<128x128xf32>
    %cst = arith.constant dense<0.000000e+00> : vector<1x128xf32>
    %3 = tpu.matmul %0, %2, %cst {dimension_numbers = #tpu.dot_dimension_numbers<[1], [0], [0], [1], [0, 0, 1, 1], [], []>} : vector<1x128xf32>, vector<128x128xf32>, vector<1x128xf32> -> vector<1x128xf32>
    %c0_4 = arith.constant 0 : index
    %c0_5 = arith.constant 0 : index
    %c0_6 = arith.constant 0 : index
    %4 = vector.load %arg2[%c0_4, %c0_5, %c0_6] : memref<4x1x128xf32, #tpu.memory_space<vmem>>, vector<1x1x128xf32>
    %5 = vector.shape_cast %4 : vector<1x1x128xf32> to vector<1x128xf32>
    %6 = arith.addf %3, %5 : vector<1x128xf32>
    %cst_7 = arith.constant 0.000000e+00 : f32
    %7 = vector.broadcast %cst_7 : f32 to vector<1x128xf32>
    %8 = arith.maximumf %6, %7 : vector<1x128xf32>
    %c1 = arith.constant 1 : index
    %c0_8 = arith.constant 0 : index
    %c0_9 = arith.constant 0 : index
    %9 = vector.load %arg1[%c1, %c0_8, %c0_9] : memref<4x128x128xf32, #tpu.memory_space<vmem>>, vector<1x128x128xf32>
    %10 = vector.shape_cast %9 : vector<1x128x128xf32> to vector<128x128xf32>
    %cst_10 = arith.constant dense<0.000000e+00> : vector<1x128xf32>
    %11 = tpu.matmul %8, %10, %cst_10 {dimension_numbers = #tpu.dot_dimension_numbers<[1], [0], [0], [1], [0, 0, 1, 1], [], []>} : vector<1x128xf32>, vector<128x128xf32>, vector<1x128xf32> -> vector<1x128xf32>
    %c1_11 = arith.constant 1 : index
    %c0_12 = arith.constant 0 : index
    %c0_13 = arith.constant 0 : index
    %12 = vector.load %arg2[%c1_11, %c0_12, %c0_13] : memref<4x1x128xf32, #tpu.memory_space<vmem>>, vector<1x1x128xf32>
    %13 = vector.shape_cast %12 : vector<1x1x128xf32> to vector<1x128xf32>
    %14 = arith.addf %11, %13 : vector<1x128xf32>
    %cst_14 = arith.constant 0.000000e+00 : f32
    %15 = vector.broadcast %cst_14 : f32 to vector<1x128xf32>
    %16 = arith.maximumf %14, %15 : vector<1x128xf32>
    %c2 = arith.constant 2 : index
    %c0_15 = arith.constant 0 : index
    %c0_16 = arith.constant 0 : index
    %17 = vector.load %arg1[%c2, %c0_15, %c0_16] : memref<4x128x128xf32, #tpu.memory_space<vmem>>, vector<1x128x128xf32>
    %18 = vector.shape_cast %17 : vector<1x128x128xf32> to vector<128x128xf32>
    %cst_17 = arith.constant dense<0.000000e+00> : vector<1x128xf32>
    %19 = tpu.matmul %16, %18, %cst_17 {dimension_numbers = #tpu.dot_dimension_numbers<[1], [0], [0], [1], [0, 0, 1, 1], [], []>} : vector<1x128xf32>, vector<128x128xf32>, vector<1x128xf32> -> vector<1x128xf32>
    %c2_18 = arith.constant 2 : index
    %c0_19 = arith.constant 0 : index
    %c0_20 = arith.constant 0 : index
    %20 = vector.load %arg2[%c2_18, %c0_19, %c0_20] : memref<4x1x128xf32, #tpu.memory_space<vmem>>, vector<1x1x128xf32>
    %21 = vector.shape_cast %20 : vector<1x1x128xf32> to vector<1x128xf32>
    %22 = arith.addf %19, %21 : vector<1x128xf32>
    %cst_21 = arith.constant 0.000000e+00 : f32
    %23 = vector.broadcast %cst_21 : f32 to vector<1x128xf32>
    %24 = arith.maximumf %22, %23 : vector<1x128xf32>
    %c3 = arith.constant 3 : index
    %c0_22 = arith.constant 0 : index
    %c0_23 = arith.constant 0 : index
    %25 = vector.load %arg1[%c3, %c0_22, %c0_23] : memref<4x128x128xf32, #tpu.memory_space<vmem>>, vector<1x128x128xf32>
    %26 = vector.shape_cast %25 : vector<1x128x128xf32> to vector<128x128xf32>
    %cst_24 = arith.constant dense<0.000000e+00> : vector<1x128xf32>
    %27 = tpu.matmul %24, %26, %cst_24 {dimension_numbers = #tpu.dot_dimension_numbers<[1], [0], [0], [1], [0, 0, 1, 1], [], []>} : vector<1x128xf32>, vector<128x128xf32>, vector<1x128xf32> -> vector<1x128xf32>
    %c3_25 = arith.constant 3 : index
    %c0_26 = arith.constant 0 : index
    %c0_27 = arith.constant 0 : index
    %28 = vector.load %arg2[%c3_25, %c0_26, %c0_27] : memref<4x1x128xf32, #tpu.memory_space<vmem>>, vector<1x1x128xf32>
    %29 = vector.shape_cast %28 : vector<1x1x128xf32> to vector<1x128xf32>
    %30 = arith.addf %27, %29 : vector<1x128xf32>
    %c0_28 = arith.constant 0 : index
    %c0_29 = arith.constant 0 : index
    %31 = vector.load %arg3[%c0_28, %c0_29] : memref<1x128xf32, #tpu.memory_space<vmem>>, vector<1x128xf32>
    tpu.vector_store %arg3[%c0_28, %c0_29], %30 {strides = array<i32>} : memref<1x128xf32, #tpu.memory_space<vmem>>, vector<1x128xf32>,
    return
  }
}

</mosaic_0001>

<bundles_post_ra>
// kernel: tpu_custom_call.1
= control target key start
LH: loop header
LB: loop body
LE: loop exit
PB: predicated region body
PF: predicated region fallthrough
CT: control target
= control target key end

     0   :  { %8 = vsyncpa [#allocation3], 0  ;;  %s847_s0 = inlined_call_operand.hbm [shape: f32[1,128], index: 0, kind: input, shape index: {}]   ;;  %s848_s1 = inlined_call_operand.hbm [shape: f32[4,128,128], index: 1, kind: input, shape index: {}]   ;;  %s849_s2 = inlined_call_operand.hbm [shape: f32[4,1,128], index: 2, kind: input, shape index: {}]   ;;  %s850_s3 = inlined_call_operand.hbm [shape: f32[1,128], index: 3, kind: output, shape index: {}]  }
   0x1   :  { %9 = vsyncpa [#allocation6], 0 }
   0x2   :  { %10 = vsyncpa [#allocation4], 0  ;;  %s733_s12 = smov [#allocation5]  }
   0x3   :  { %s26_s13 = sshll.u32 %s733_s12, 4  ;;  %s27_s13 = int_to_ptr.vmem [resolvable:$true] %s26_s13 }
   0x4   :  { %s655_s14 = scalar_lea.vmem %s27_s13, 8192  ;;  %p660_p1 = scmp.lt.s32.totalorder %s27_s13, %s27_s13 }
   0x5   :  { %p656_p0 = scmp.ne.s32.totalorder %s27_s13, %s655_s14  ;;  %p661_p2 = scmp.lt.s32.totalorder %s655_s14, %s655_s14 }
   0x7   :  { %p662_p3 = por %p661_p2, %p660_p1 }
   0x9   :  { %p663_p4 = pnand %p662_p3, %p656_p0 }
   0xb   :  { %666 = shalt.err (!%p663_p4)
}
   0xc   :  { %s734_s15 = smov 128   ;;  %s735_s16 = smov 8  }
   0xd   :  { %32 = dma.hbm_to_vmem [thread:$0]  %s848_s1, 8192, %s27_s13, [#allocation6], %s734_s15, %s734_s15, %s735_s16  }
   0xe   :  { %s736_s19 = smov [#allocation2]   ;;  %s737_s21 = smov [#allocation7]  }
   0xf   :  { %s17_s20 = sshll.u32 %s736_s19, 4  ;;  %s38_s22 = sshll.u32 %s737_s21, 4  ;;  %s18_s20 = int_to_ptr.vmem [resolvable:$true] %s17_s20  ;;  %s39_s22 = int_to_ptr.vmem [resolvable:$true] %s38_s22 }
  0x10   :  { %s675_s23 = scalar_lea.vmem %s18_s20, 16  ;;  %s679_s24 = scalar_lea.vmem %s18_s20, 32 }
  0x11   :  { %p676_p5 = scmp.ne.s32.totalorder %s18_s20, %s675_s23  ;;  %p680_p6 = scmp.lt.s32.totalorder %s18_s20, %s18_s20 }
  0x12   :  { %p681_p7 = scmp.lt.s32.totalorder %s679_s24, %s675_s23 }
  0x14   :  { %p682_p8 = por %p681_p7, %p680_p6 }
  0x16   :  { %p683_p9 = pnand %p682_p8, %p676_p5 }
  0x18   :  { %686 = shalt.err (!%p683_p9)
}
  0x19   :  { %20 = dma.hbm_to_vmem [thread:$0]  %s847_s0, 16, %s18_s20, [#allocation3]  }
  0x1a   :  { %s695_s27 = scalar_lea.vmem %s39_s22, 64  ;;  %p700_p11 = scmp.lt.s32.totalorder %s39_s22, %s39_s22 }
  0x1b   :  { %p696_p10 = scmp.ne.s32.totalorder %s39_s22, %s695_s27  ;;  %p701_p12 = scmp.lt.s32.totalorder %s695_s27, %s695_s27 }
  0x1d   :  { %p702_p13 = por %p701_p12, %p700_p11 }
  0x1f   :  { %p703_p0 = pnand %p702_p13, %p696_p10 }
  0x21   :  { %706 = shalt.err (!%p703_p0)
}
  0x22   :  { %s738_s1 = smov 16   ;;  %s739_s28 = smov 1  }
  0x23   :  { %44 = dma.hbm_to_vmem [thread:$0]  %s849_s2, 64, %s39_s22, [#allocation6], %s738_s1, %s738_s1, %s739_s28  }
  0x24   :  { %727 = dma.done.wait [#allocation3], 16  }
  0x25   :  { %728 = vsyncadd [#allocation3], 4294967280 }
  0x26   :  { %729 = dma.done.wait [#allocation6], 8256  }
  0x27   :  { %730 = vsyncadd [#allocation6], 4294959040  ;;  %v740_v0 = vmov 0.0   ;;  %vm741_vm0 = vmmov 0   ;;  %v70_v1 = vld [vmem:[#allocation5 + $0x78] sm:$0xff]  ;;  %v69_v2 = vld [vmem:[#allocation5 + $0x70] sm:$0xff] }
  0x28   :  { %497 = vmatprep.subr.mxu0 %v740_v0  ;;  %529 = vmatprep.mubr.msk.f32.mxu0 %vm741_vm0, %v740_v0  ;;  %v68_v3 = vld [vmem:[#allocation5 + $0x68] sm:$0xff]  ;;  %v67_v4 = vld [vmem:[#allocation5 + $0x60] sm:$0xff]  ;;  %v159_v5 = vld [vmem:[#allocation5 + $0xf8] sm:$0xff]  ;;  %s742_s0 = smov [#allocation8]  }
  0x29   :  { %532 = vmatprep.subr.mxu1 %v740_v0  ;;  %564 = vmatprep.mubr.msk.f32.mxu1 %vm741_vm0, %v740_v0  ;;  %v66_v6 = vld [vmem:[#allocation5 + $0x58] sm:$0xff]  ;;  %v158_v7 = vld [vmem:[#allocation5 + $0xf0] sm:$0xff]  ;;  %v157_v8 = vld [vmem:[#allocation5 + $0xe8] sm:$0xff]  ;;  %s419_s2 = sshll.u32 %s742_s0, 4  ;;  %s420_s2 = int_to_ptr.vmem [resolvable:$true] %s419_s2 }
  0x2a   :  { %498 = vmatpush3.msra.mxu0 %v70_v1  ;;  %533 = vmatpush3.msra.mxu1 %v159_v5  ;;  %v65_v9 = vld [vmem:[#allocation5 + $0x50] sm:$0xff]  ;;  %v156_v10 = vld [vmem:[#allocation5 + $0xe0] sm:$0xff]  ;;  %v64_v11 = vld [vmem:[#allocation5 + $0x48] sm:$0xff]  ;;  %s707_s4 = scalar_lea.vmem %s420_s2, 16  ;;  %s711_s5 = scalar_lea.vmem %s420_s2, 32 }
  0x2b   :  { %499 = vmatprep.subr.mxu0 %v740_v0  ;;  %534 = vmatprep.subr.mxu1 %v740_v0  ;;  %v155_v12 = vld [vmem:[#allocation5 + $0xd8] sm:$0xff]  ;;  %v63_v13 = vld [vmem:[#allocation5 + $0x40] sm:$0xff]  ;;  %v154_v14 = vld [vmem:[#allocation5 + $0xd0] sm:$0xff]  ;;  %p708_p1 = scmp.ne.s32.totalorder %s420_s2, %s707_s4  ;;  %p712_p2 = scmp.lt.s32.totalorder %s420_s2, %s420_s2 }
  0x2c   :  { %500 = vmatpush3.msra.mxu0 %v69_v2  ;;  %535 = vmatpush3.msra.mxu1 %v158_v7  ;;  %v62_v15 = vld [vmem:[#allocation5 + $0x38] sm:$0xff]  ;;  %v153_v16 = vld [vmem:[#allocation5 + $0xc8] sm:$0xff]  ;;  %v61_v17 = vld [vmem:[#allocation5 + $0x30] sm:$0xff]  ;;  %p713_p3 = scmp.lt.s32.totalorder %s711_s5, %s707_s4 }
  0x2d   :  { %501 = vmatprep.subr.mxu0 %v740_v0  ;;  %536 = vmatprep.subr.mxu1 %v740_v0  ;;  %v152_v18 = vld [vmem:[#allocation5 + $0xc0] sm:$0xff]  ;;  %v60_v19 = vld [vmem:[#allocation5 + $0x28] sm:$0xff]  ;;  %v151_v20 = vld [vmem:[#allocation5 + $0xb8] sm:$0xff] }
  0x2e   :  { %502 = vmatpush3.msra.mxu0 %v68_v3  ;;  %537 = vmatpush3.msra.mxu1 %v157_v8  ;;  %v59_v21 = vld [vmem:[#allocation5 + $0x20] sm:$0xff]  ;;  %v150_v22 = vld [vmem:[#allocation5 + $0xb0] sm:$0xff]  ;;  %v58_v23 = vld [vmem:[#allocation5 + $0x18] sm:$0xff]  ;;  %p714_p4 = por %p713_p3, %p712_p2 }
  0x2f   :  { %503 = vmatprep.subr.mxu0 %v740_v0  ;;  %538 = vmatprep.subr.mxu1 %v740_v0  ;;  %v149_v24 = vld [vmem:[#allocation5 + $0xa8] sm:$0xff]  ;;  %v57_v25 = vld [vmem:[#allocation5 + $0x10] sm:$0xff]  ;;  %v148_v26 = vld [vmem:[#allocation5 + $0xa0] sm:$0xff] }
  0x30   :  { %504 = vmatpush3.msra.mxu0 %v67_v4  ;;  %539 = vmatpush3.msra.mxu1 %v156_v10  ;;  %v56_v27 = vld [vmem:[#allocation5 + $0x8] sm:$0xff]  ;;  %v147_v28 = vld [vmem:[#allocation5 + $0x98] sm:$0xff]  ;;  %v55_v29 = vld [vmem:[#allocation5] sm:$0xff]  ;;  %p715_p5 = pnand %p714_p4, %p708_p1 }
  0x31   :  { %505 = vmatprep.subr.mxu0 %v740_v0  ;;  %540 = vmatprep.subr.mxu1 %v740_v0  ;;  %v54_v30 = vld [vmem:[#allocation2] sm:$0x1]  ;;  %v146_v31 = vld [vmem:[#allocation5 + $0x90] sm:$0xff]  ;;  %v145_v32 = vld [vmem:[#allocation5 + $0x88] sm:$0xff] }
  0x32   :  { %506 = vmatpush3.msra.mxu0 %v66_v6  ;;  %541 = vmatpush3.msra.mxu1 %v155_v12  ;;  %v144_v33 = vld [vmem:[#allocation5 + $0x80] sm:$0xff]  ;;  %v249_v34 = vld [vmem:[#allocation5 + $0x178] sm:$0xff]  ;;  %v248_v35 = vld [vmem:[#allocation5 + $0x170] sm:$0xff] }
  0x33   :  { %507 = vmatprep.subr.mxu0 %v740_v0  ;;  %542 = vmatprep.subr.mxu1 %v740_v0  ;;  %v247_v36 = vld [vmem:[#allocation5 + $0x168] sm:$0xff]  ;;  %v246_v37 = vld [vmem:[#allocation5 + $0x160] sm:$0xff]  ;;  %v245_v38 = vld [vmem:[#allocation5 + $0x158] sm:$0xff] }
  0x34   :  { %508 = vmatpush3.msra.mxu0 %v65_v9  ;;  %543 = vmatpush3.msra.mxu1 %v154_v14  ;;  %v244_v39 = vld [vmem:[#allocation5 + $0x150] sm:$0xff]  ;;  %v243_v40 = vld [vmem:[#allocation5 + $0x148] sm:$0xff]  ;;  %v242_v41 = vld [vmem:[#allocation5 + $0x140] sm:$0xff] }
  0x35   :  { %509 = vmatprep.subr.mxu0 %v740_v0  ;;  %544 = vmatprep.subr.mxu1 %v740_v0  ;;  %v241_v42 = vld [vmem:[#allocation5 + $0x138] sm:$0xff]  ;;  %v240_v43 = vld [vmem:[#allocation5 + $0x130] sm:$0xff]  ;;  %v239_v44 = vld [vmem:[#allocation5 + $0x128] sm:$0xff] }
  0x36   :  { %510 = vmatpush3.msra.mxu0 %v64_v11  ;;  %545 = vmatpush3.msra.mxu1 %v153_v16  ;;  %v238_v45 = vld [vmem:[#allocation5 + $0x120] sm:$0xff]  ;;  %v237_v46 = vld [vmem:[#allocation5 + $0x118] sm:$0xff]  ;;  %v236_v52 = vld [vmem:[#allocation5 + $0x110] sm:$0xff] }
  0x37   :  { %511 = vmatprep.subr.mxu0 %v740_v0  ;;  %546 = vmatprep.subr.mxu1 %v740_v0  ;;  %v71_v47 = vld [vmem:[#allocation7] sm:$0x1]  ;;  %v235_v53 = vld [vmem:[#allocation5 + $0x108] sm:$0xff]  ;;  %v339_v55 = vld [vmem:[#allocation5 + $0x1f8] sm:$0xff] }
  0x38   :  { %512 = vmatpush3.msra.mxu0 %v63_v13  ;;  %547 = vmatpush3.msra.mxu1 %v152_v18  ;;  %v234_v54 = vld [vmem:[#allocation5 + $0x100] sm:$0xff]  ;;  %v338_v56 = vld [vmem:[#allocation5 + $0x1f0] sm:$0xff]  ;;  %v337_v57 = vld [vmem:[#allocation5 + $0x1e8] sm:$0xff] }
  0x39   :  { %513 = vmatprep.subr.mxu0 %v740_v0  ;;  %548 = vmatprep.subr.mxu1 %v740_v0  ;;  %v336_v58 = vld [vmem:[#allocation5 + $0x1e0] sm:$0xff]  ;;  %v335_v59 = vld [vmem:[#allocation5 + $0x1d8] sm:$0xff]  ;;  %v334_v60 = vld [vmem:[#allocation5 + $0x1d0] sm:$0xff] }
  0x3a   :  { %514 = vmatpush3.msra.mxu0 %v62_v15  ;;  %549 = vmatpush3.msra.mxu1 %v151_v20  ;;  %v333_v61 = vld [vmem:[#allocation5 + $0x1c8] sm:$0xff]  ;;  %v332_v62 = vld [vmem:[#allocation5 + $0x1c0] sm:$0xff]  ;;  %v331_v63 = vld [vmem:[#allocation5 + $0x1b8] sm:$0xff] }
  0x3b   :  { %515 = vmatprep.subr.mxu0 %v740_v0  ;;  %550 = vmatprep.subr.mxu1 %v740_v0  ;;  %v330_v1 = vld [vmem:[#allocation5 + $0x1b0] sm:$0xff]  ;;  %v329_v2 = vld [vmem:[#allocation5 + $0x1a8] sm:$0xff]  ;;  %v328_v3 = vld [vmem:[#allocation5 + $0x1a0] sm:$0xff] }
  0x3c   :  { %516 = vmatpush3.msra.mxu0 %v61_v17  ;;  %551 = vmatpush3.msra.mxu1 %v150_v22  ;;  %v327_v4 = vld [vmem:[#allocation5 + $0x198] sm:$0xff]  ;;  %v161_v5 = vld [vmem:[#allocation7 + $0x1] sm:$0x1]  ;;  %v326_v10 = vld [vmem:[#allocation5 + $0x190] sm:$0xff] }
  0x3d   :  { %517 = vmatprep.subr.mxu0 %v740_v0  ;;  %552 = vmatprep.subr.mxu1 %v740_v0  ;;  %v325_v11 = vld [vmem:[#allocation5 + $0x188] sm:$0xff]  ;;  %v324_v12 = vld [vmem:[#allocation5 + $0x180] sm:$0xff] }
  0x3e   :  { %518 = vmatpush3.msra.mxu0 %v60_v19  ;;  %553 = vmatpush3.msra.mxu1 %v149_v24  ;;  %v251_v13 = vld [vmem:[#allocation7 + $0x2] sm:$0x1]  ;;  %v341_v18 = vld [vmem:[#allocation7 + $0x3] sm:$0x1] }
  0x3f   :  { %519 = vmatprep.subr.mxu0 %v740_v0  ;;  %554 = vmatprep.subr.mxu1 %v740_v0 }
  0x40   :  { %520 = vmatpush3.msra.mxu0 %v59_v21  ;;  %555 = vmatpush3.msra.mxu1 %v148_v26 }
  0x41   :  { %521 = vmatprep.subr.mxu0 %v740_v0  ;;  %556 = vmatprep.subr.mxu1 %v740_v0 }
  0x42   :  { %522 = vmatpush3.msra.mxu0 %v58_v23  ;;  %557 = vmatpush3.msra.mxu1 %v147_v28 }
  0x43   :  { %523 = vmatprep.subr.mxu0 %v740_v0  ;;  %558 = vmatprep.subr.mxu1 %v740_v0 }
  0x44   :  { %524 = vmatpush3.msra.mxu0 %v57_v25  ;;  %559 = vmatpush3.msra.mxu1 %v146_v31 }
  0x45   :  { %525 = vmatprep.subr.mxu0 %v740_v0  ;;  %560 = vmatprep.subr.mxu1 %v740_v0 }
  0x46   :  { %526 = vmatpush3.msra.mxu0 %v56_v27  ;;  %561 = vmatpush3.msra.mxu1 %v145_v32 }
  0x47   :  { %527 = vmatprep.subr.mxu0 %v740_v0  ;;  %562 = vmatprep.subr.mxu1 %v740_v0 }
  0x48   :  { %528 = vmatpush3.msra.mxu0 %v55_v29  ;;  %563 = vmatpush3.msra.mxu1 %v144_v33 }
  0x49   :  { %530 = vmatmul.mubr.f32.vlgmr.msra.gmra.mxu0 %v54_v30  ;;  %567 = vmatprep.subr.mxu0 %v740_v0 }
  0x4a   :  { %599 = vmatprep.mubr.msk.f32.mxu0 %vm741_vm0, %v740_v0  ;;  %602 = vmatprep.subr.mxu1 %v740_v0 }
  0x4b   :  { %568 = vmatpush3.msra.mxu0 %v249_v34 }
  0x4c   :  { %569 = vmatprep.subr.mxu0 %v740_v0 }
  0x4d   :  { %570 = vmatpush3.msra.mxu0 %v248_v35 }
  0x4e   :  { %571 = vmatprep.subr.mxu0 %v740_v0 }
  0x4f   :  { %572 = vmatpush3.msra.mxu0 %v247_v36 }
  0x50   :  { %573 = vmatprep.subr.mxu0 %v740_v0 }
  0x51   :  { %574 = vmatpush3.msra.mxu0 %v246_v37 }
  0x52   :  { %575 = vmatprep.subr.mxu0 %v740_v0 }
  0x53   :  { %576 = vmatpush3.msra.mxu0 %v245_v38 }
  0x54   :  { %577 = vmatprep.subr.mxu0 %v740_v0 }
  0x55   :  { %578 = vmatpush3.msra.mxu0 %v244_v39 }
  0x56   :  { %579 = vmatprep.subr.mxu0 %v740_v0 }
  0x57   :  { %580 = vmatpush3.msra.mxu0 %v243_v40 }
  0x58   :  { %581 = vmatprep.subr.mxu0 %v740_v0 }
  0x59   :  { %582 = vmatpush3.msra.mxu0 %v242_v41 }
  0x5a   :  { %583 = vmatprep.subr.mxu0 %v740_v0 }
  0x5b   :  { %584 = vmatpush3.msra.mxu0 %v241_v42 }
  0x5c   :  { %585 = vmatprep.subr.mxu0 %v740_v0 }
  0x5d   :  { %586 = vmatpush3.msra.mxu0 %v240_v43 }
  0x5e   :  { %587 = vmatprep.subr.mxu0 %v740_v0 }
  0x5f   :  { %588 = vmatpush3.msra.mxu0 %v239_v44 }
  0x60   :  { %589 = vmatprep.subr.mxu0 %v740_v0 }
  0x61   :  { %590 = vmatpush3.msra.mxu0 %v238_v45 }
  0x62   :  { %591 = vmatprep.subr.mxu0 %v740_v0 }
  0x63   :  { %592 = vmatpush3.msra.mxu0 %v237_v46 }
  0x64   :  { %593 = vmatprep.subr.mxu0 %v740_v0 }
  0x65   :  { %594 = vmatpush3.msra.mxu0 %v236_v52 }
  0x66   :  { %595 = vmatprep.subr.mxu0 %v740_v0 }
  0x67   :  { %596 = vmatpush3.msra.mxu0 %v235_v53 }
  0x68   :  { %597 = vmatprep.subr.mxu0 %v740_v0 }
  0x69   :  { %598 = vmatpush3.msra.mxu0 %v234_v54 }
 0x109   :  { %v138_v48 = vpop.f32.mrf.mxu0 }
 0x10a   :  { %v139_v49 = vadd.f32 %v138_v48, %v71_v47 }
 0x10b   :  { %v531_v50 = vpop.f32.mrf.mxu0 }
 0x10c   :  { %v142_v51 = vmax.f32 %v139_v49, 0.0 }
 0x10e   :  { %565 = vmatmul.mubr.f32.vlgmr.msra.gmra.mxu1 %v142_v51 }
 0x10f   :  { %634 = vmatprep.mubr.msk.f32.mxu1 %vm741_vm0, %v740_v0  ;;  %603 = vmatpush3.msra.mxu1 %v339_v55 }
 0x110   :  { %604 = vmatprep.subr.mxu1 %v740_v0 }
 0x111   :  { %605 = vmatpush3.msra.mxu1 %v338_v56 }
 0x112   :  { %606 = vmatprep.subr.mxu1 %v740_v0 }
 0x113   :  { %607 = vmatpush3.msra.mxu1 %v337_v57 }
 0x114   :  { %608 = vmatprep.subr.mxu1 %v740_v0 }
 0x115   :  { %609 = vmatpush3.msra.mxu1 %v336_v58 }
 0x116   :  { %610 = vmatprep.subr.mxu1 %v740_v0 }
 0x117   :  { %611 = vmatpush3.msra.mxu1 %v335_v59 }
 0x118   :  { %612 = vmatprep.subr.mxu1 %v740_v0 }
 0x119   :  { %613 = vmatpush3.msra.mxu1 %v334_v60 }
 0x11a   :  { %614 = vmatprep.subr.mxu1 %v740_v0 }
 0x11b   :  { %615 = vmatpush3.msra.mxu1 %v333_v61 }
 0x11c   :  { %616 = vmatprep.subr.mxu1 %v740_v0 }
 0x11d   :  { %617 = vmatpush3.msra.mxu1 %v332_v62 }
 0x11e   :  { %618 = vmatprep.subr.mxu1 %v740_v0 }
 0x11f   :  { %619 = vmatpush3.msra.mxu1 %v331_v63 }
 0x120   :  { %620 = vmatprep.subr.mxu1 %v740_v0 }
 0x121   :  { %621 = vmatpush3.msra.mxu1 %v330_v1 }
 0x122   :  { %622 = vmatprep.subr.mxu1 %v740_v0 }
 0x123   :  { %623 = vmatpush3.msra.mxu1 %v329_v2 }
 0x124   :  { %624 = vmatprep.subr.mxu1 %v740_v0 }
 0x125   :  { %625 = vmatpush3.msra.mxu1 %v328_v3 }
 0x126   :  { %626 = vmatprep.subr.mxu1 %v740_v0 }
 0x127   :  { %627 = vmatpush3.msra.mxu1 %v327_v4 }
 0x128   :  { %628 = vmatprep.subr.mxu1 %v740_v0 }
 0x129   :  { %629 = vmatpush3.msra.mxu1 %v326_v10 }
 0x12a   :  { %630 = vmatprep.subr.mxu1 %v740_v0 }
 0x12b   :  { %631 = vmatpush3.msra.mxu1 %v325_v11 }
 0x12c   :  { %632 = vmatprep.subr.mxu1 %v740_v0 }
 0x12d   :  { %633 = vmatpush3.msra.mxu1 %v324_v12 }
 0x1ce   :  { %v228_v6 = vpop.f32.mrf.mxu1 }
 0x1cf   :  { %v229_v7 = vadd.f32 %v228_v6, %v161_v5 }
 0x1d0   :  { %v566_v8 = vpop.f32.mrf.mxu1 }
 0x1d1   :  { %v232_v9 = vmax.f32 %v229_v7, 0.0 }
 0x1d3   :  { %600 = vmatmul.mubr.f32.vlgmr.msra.gmra.mxu0 %v232_v9 }
 0x293   :  { %v318_v14 = vpop.f32.mrf.mxu0 }
 0x294   :  { %v319_v15 = vadd.f32 %v318_v14, %v251_v13 }
 0x295   :  { %v601_v16 = vpop.f32.mrf.mxu0 }
 0x296   :  { %v322_v17 = vmax.f32 %v319_v15, 0.0 }
 0x298   :  { %635 = vmatmul.mubr.f32.vlgmr.msra.gmra.mxu1 %v322_v17 }
 0x358   :  { %v408_v19 = vpop.f32.mrf.mxu1 }
 0x359   :  { %v409_v20 = vadd.f32 %v408_v19, %v341_v18 }
 0x35a   :  { %v636_v21 = vpop.f32.mrf.mxu1 }
 0x35b   :  { %412 = vst [vmem:[#allocation8] sm:$0x1] %v409_v20 }
 0x35c   :  { %718 = shalt.err (!%p715_p5)
}
 0x35d   :  { %422 = dma.vmem_to_hbm [thread:$0]  %s420_s2, 16, %s850_s3, [#allocation4]  }
 0x35e   :  { %731 = dma.done.wait [#allocation4], 16  }
 0x35f   :  { %732 = vsyncadd [#allocation4], 4294967280 }
 0x360   :  { %426 = vsyncpa [#allocation3], 1 }
 0x361   :  { %427 = vsyncpa [#allocation6], 1 }
 0x362   :  { %428 = vsyncpa [#allocation4], 1 }

</bundles_post_ra>
